<compile_context>
chip_gen: v5e
topology: v5e:2x2
jax: 0.10.0
libtpu: 0.0.40
codegen_flags: <defaults>
</compile_context>

<pallas_src>
import functools
import math

import jax
import jax.numpy as jnp
from jax import lax
from jax.experimental import pallas as pl
from jax.experimental.pallas import tpu as pltpu

# CartPole-like defaults (env.observation_space.shape[0], env.action_space.n)
N_STATES = 4
N_ACTIONS = 2
HIDDEN = 50


def _mlp_kernel(x_ref, w1_ref, b1_ref, w2_ref, b2_ref, w3_ref, b3_ref, o_ref):
    """One batch tile.

    x_ref : (TILE_B, N_STATES)  batch-major, exactly as the caller stores it
    w*    : PyTorch nn.Linear layout (out_features, in_features), VMEM-resident
    b*    : (out_features, 1)
    o_ref : (N_ACTIONS, TILE_B) feature-major -> lane-dense output stores
    """
    x = x_ref[...]
    # h1_T = w1 @ x.T : contract the in-feature axis of both operands, so the
    # transpose is folded into the MXU op instead of a wrapper-side HBM pass.
    h1 = lax.dot_general(w1_ref[...], x, (((1,), (1,)), ((), ())),
                         preferred_element_type=jnp.float32) + b1_ref[...]
    h1 = jnp.maximum(h1, 0.0)                                     # ReLU
    h2 = jnp.dot(w2_ref[...], h1,
                 preferred_element_type=jnp.float32) + b2_ref[...]
    h2 = jnp.maximum(h2, 0.0)                                     # ReLU
    o_ref[...] = (jnp.dot(w3_ref[...], h2,
                          preferred_element_type=jnp.float32) + b3_ref[...])


def _round_up(n, m):
    return ((n + m - 1) // m) * m


def _vmem_limit_bytes(tb):
    """VMEM budget derived from the chosen batch tile (f32 path)."""
    x_blk = tb * 128 * 4        # (tb, 4) block: lane dim padded 4 -> 128 in VMEM
    o_blk = 8 * tb * 4          # (2, tb) block: sublane dim padded 2 -> 8
    inter = 2 * 56 * tb * 4     # two (50 -> 56-sublane, tb) f32 intermediates
    wgt = 3 * 64 * 128 * 4      # padded weight/bias tiles (generous)
    need = 2 * (x_blk + o_blk) + inter + wgt       # in/out are double-buffered
    # Headroom for compiler scratch; keep well under v7x's 64 MiB physical VMEM.
    return int(min(56 * 1024 * 1024, need + 8 * 1024 * 1024))


def net_forward_reference(x, params):
    """Pure-JAX reference; also the dispatch target for small DQN batches."""
    h = jnp.maximum(x @ params["w1"].T + params["b1"].T, 0.0)
    h = jnp.maximum(h @ params["w2"].T + params["b2"].T, 0.0)
    return h @ params["w3"].T + params["b3"].T


@functools.partial(jax.jit, static_argnames=("tile_cap", "min_pallas_batch"))
def net_forward(x, params, *, tile_cap=8192, min_pallas_batch=2048):
    """Forward pass.  x: (B, N_STATES) f32 -> (B, N_ACTIONS) f32.

    tile_cap: max batch-tile size (multiple of 128).
    min_pallas_batch: below this (static) batch size, use the XLA reference —
    tiny DQN batches cannot amortise the pallas_call fixed cost.
    """
    assert tile_cap >= 128 and tile_cap % 128 == 0
    B = x.shape[0]
    if B < min_pallas_batch:
        return net_forward_reference(x, params)

    w1, b1, w2, b2, w3, b3 = (params["w1"], params["b1"], params["w2"],
                              params["b2"], params["w3"], params["b3"])

    # Tile selection: pad only to lane granularity (128) plus tile balancing
    # (waste <= ~n_tiles*128 rows, never a full tile), and force >=2 tiles
    # whenever possible so v7x can shard them across its two TensorCores.
    bp0 = _round_up(B, 128)
    n_tiles = max(1, pl.cdiv(bp0, tile_cap))
    if bp0 >= 256:
        n_tiles = max(n_tiles, 2)
    tb = _round_up(pl.cdiv(bp0, n_tiles), 128)
    bp = n_tiles * tb

    x_in = x if bp == B else jnp.pad(x, ((0, bp - B), (0, 0)))

    flops = 2 * bp * (N_STATES * HIDDEN + HIDDEN * HIDDEN + HIDDEN * N_ACTIONS)
    bytes_accessed = bp * 4 * (N_STATES + N_ACTIONS) + 4 * (
        HIDDEN * N_STATES + HIDDEN + HIDDEN * HIDDEN + HIDDEN
        + N_ACTIONS * HIDDEN + N_ACTIONS)

    out_t = pl.pallas_call(
        _mlp_kernel,
        out_shape=jax.ShapeDtypeStruct((N_ACTIONS, bp), jnp.float32),
        grid=(n_tiles,),
        in_specs=[
            pl.BlockSpec((tb, N_STATES), lambda i: (i, 0)),       # x tile (pipelined)
            pl.BlockSpec((HIDDEN, N_STATES), lambda i: (0, 0)),   # w1 (resident)
            pl.BlockSpec((HIDDEN, 1), lambda i: (0, 0)),          # b1
            pl.BlockSpec((HIDDEN, HIDDEN), lambda i: (0, 0)),     # w2
            pl.BlockSpec((HIDDEN, 1), lambda i: (0, 0)),          # b2
            pl.BlockSpec((N_ACTIONS, HIDDEN), lambda i: (0, 0)),  # w3
            pl.BlockSpec((N_ACTIONS, 1), lambda i: (0, 0)),       # b3
        ],
        out_specs=pl.BlockSpec((N_ACTIONS, tb), lambda i: (0, i)),
        compiler_params=pltpu.CompilerParams(
            dimension_semantics=("parallel",),          # shard tiles across TCs
            vmem_limit_bytes=_vmem_limit_bytes(tb),     # derived from the tile
        ),
        cost_estimate=pl.CostEstimate(flops=int(flops), transcendentals=0,
                                      bytes_accessed=int(bytes_accessed)),
    )(x_in, w1, b1, w2, b2, w3, b3)

    out_t = out_t if bp == B else out_t[:, :B]
    return out_t.T                                      # tiny (2, B) -> (B, 2)


def init_params(key):
    """PyTorch nn.Linear layout (out_features, in_features).  Weights ~ N(0,0.1)
    like the module's __init__; biases ~ U(-1/sqrt(fan_in), 1/sqrt(fan_in))
    matching nn.Linear's default bias init."""
    ks = jax.random.split(key, 6)

    def ubias(k, fan_in, n_out):
        bound = 1.0 / math.sqrt(fan_in)
        return jax.random.uniform(k, (n_out, 1), jnp.float32, -bound, bound)

    return {
        "w1": 0.1 * jax.random.normal(ks[0], (HIDDEN, N_STATES), jnp.float32),
        "b1": ubias(ks[1], N_STATES, HIDDEN),
        "w2": 0.1 * jax.random.normal(ks[2], (HIDDEN, HIDDEN), jnp.float32),
        "b2": ubias(ks[3], HIDDEN, HIDDEN),
        "w3": 0.1 * jax.random.normal(ks[4], (N_ACTIONS, HIDDEN), jnp.float32),
        "b3": ubias(ks[5], HIDDEN, N_ACTIONS),
    }


if __name__ == "__main__":
    key = jax.random.PRNGKey(0)
    pkey, xkey_small, xkey_mid = jax.random.split(key, 3)
    params = init_params(pkey)

    # MXU f32 matmuls (default precision) can differ slightly from the XLA
    # reference's accumulation; use tolerances that cover bf16-pass error.
    RTOL, ATOL = 2e-2, 2e-3

    # 1) Tiny DQN-style batch, Pallas path forced (single lane-dense tile).
    x_small = jax.random.normal(xkey_small, (2, N_STATES), jnp.float32)
    out_small = net_forward(x_small, params, min_pallas_batch=0)
    jax.block_until_ready(out_small)
    ref_small = net_forward_reference(x_small, params)
    assert out_small.shape == (2, N_ACTIONS)
    assert jnp.allclose(out_small, ref_small, rtol=RTOL, atol=ATOL)

    # 2) Ragged batch exercising the multi-tile pipelined grid + 128-padding
    #    (B=300 -> padded 384, grid=(3,), tiles of 128).
    x_mid = jax.random.normal(xkey_mid, (300, N_STATES), jnp.float32)
    out_mid = net_forward(x_mid, params, tile_cap=128, min_pallas_batch=0)
    jax.block_until_ready(out_mid)
    ref_mid = net_forward_reference(x_mid, params)
    assert out_mid.shape == (300, N_ACTIONS)
    assert jnp.allclose(out_mid, ref_mid, rtol=RTOL, atol=ATOL)

    # 3) Default dispatch: small batches route to the plain-XLA reference path.
    out_disp = net_forward(x_small, params)
    jax.block_until_ready(out_disp)
    assert out_disp.shape == (2, N_ACTIONS)
    assert jnp.allclose(out_disp, ref_small, rtol=RTOL, atol=ATOL)

    print("KERNEL_OK")
</pallas_src>

<mosaic_0001>
module attributes {stable_mosaic.version = 11 : i64} {
  func.func @_mlp_kernel(%arg0: i32, %arg1: memref<128x4xf32, #tpu.memory_space<vmem>>, %arg2: memref<50x4xf32, #tpu.memory_space<vmem>>, %arg3: memref<50x1xf32, #tpu.memory_space<vmem>>, %arg4: memref<50x50xf32, #tpu.memory_space<vmem>>, %arg5: memref<50x1xf32, #tpu.memory_space<vmem>>, %arg6: memref<2x50xf32, #tpu.memory_space<vmem>>, %arg7: memref<2x1xf32, #tpu.memory_space<vmem>>, %arg8: memref<2x128xf32, #tpu.memory_space<vmem>>) attributes {dimension_semantics = [#tpu.dimension_semantics<parallel>], iteration_bounds = array<i64: 1>, scalar_prefetch = 0 : i64, scratch_operands = 0 : i64, tpu.core_type = #tpu.core_type<tc>, window_params = [{transform_indices = @transform_0, window_bounds = array<i64: 128, 4>}, {pipeline_mode = #tpu.pipeline_mode<synchronous>, transform_indices = @transform_1, window_bounds = array<i64: 50, 4>}, {pipeline_mode = #tpu.pipeline_mode<synchronous>, transform_indices = @transform_2, window_bounds = array<i64: 50, 1>}, {pipeline_mode = #tpu.pipeline_mode<synchronous>, transform_indices = @transform_3, window_bounds = array<i64: 50, 50>}, {pipeline_mode = #tpu.pipeline_mode<synchronous>, transform_indices = @transform_4, window_bounds = array<i64: 50, 1>}, {pipeline_mode = #tpu.pipeline_mode<synchronous>, transform_indices = @transform_5, window_bounds = array<i64: 2, 50>}, {pipeline_mode = #tpu.pipeline_mode<synchronous>, transform_indices = @transform_6, window_bounds = array<i64: 2, 1>}, {transform_indices = @transform_7, window_bounds = array<i64: 2, 128>}]} {
    %c0 = arith.constant 0 : index
    %c0_0 = arith.constant 0 : index
    %0 = vector.load %arg1[%c0, %c0_0] : memref<128x4xf32, #tpu.memory_space<vmem>>, vector<128x4xf32>
    %c0_1 = arith.constant 0 : index
    %c0_2 = arith.constant 0 : index
    %1 = vector.load %arg2[%c0_1, %c0_2] : memref<50x4xf32, #tpu.memory_space<vmem>>, vector<50x4xf32>
    %cst = arith.constant dense<0.000000e+00> : vector<50x128xf32>
    %2 = tpu.matmul %1, %0, %cst {dimension_numbers = #tpu.dot_dimension_numbers<[1], [1], [0], [0], [0, 0, 1, 0], [], []>} : vector<50x4xf32>, vector<128x4xf32>, vector<50x128xf32> -> vector<50x128xf32>
    %c0_3 = arith.constant 0 : index
    %c0_4 = arith.constant 0 : index
    %3 = vector.load %arg3[%c0_3, %c0_4] : memref<50x1xf32, #tpu.memory_space<vmem>>, vector<50x1xf32>
    %4 = vector.broadcast %3 : vector<50x1xf32> to vector<50x128xf32>
    %5 = arith.addf %2, %4 : vector<50x128xf32>
    %cst_5 = arith.constant 0.000000e+00 : f32
    %6 = vector.broadcast %cst_5 : f32 to vector<50x128xf32>
    %7 = arith.maximumf %5, %6 : vector<50x128xf32>
    %c0_6 = arith.constant 0 : index
    %c0_7 = arith.constant 0 : index
    %8 = vector.load %arg4[%c0_6, %c0_7] : memref<50x50xf32, #tpu.memory_space<vmem>>, vector<50x50xf32>
    %cst_8 = arith.constant dense<0.000000e+00> : vector<50x128xf32>
    %9 = tpu.matmul %8, %7, %cst_8 {dimension_numbers = #tpu.dot_dimension_numbers<[1], [0], [0], [1], [0, 0, 1, 1], [], []>} : vector<50x50xf32>, vector<50x128xf32>, vector<50x128xf32> -> vector<50x128xf32>
    %c0_9 = arith.constant 0 : index
    %c0_10 = arith.constant 0 : index
    %10 = vector.load %arg5[%c0_9, %c0_10] : memref<50x1xf32, #tpu.memory_space<vmem>>, vector<50x1xf32>
    %11 = vector.broadcast %10 : vector<50x1xf32> to vector<50x128xf32>
    %12 = arith.addf %9, %11 : vector<50x128xf32>
    %cst_11 = arith.constant 0.000000e+00 : f32
    %13 = vector.broadcast %cst_11 : f32 to vector<50x128xf32>
    %14 = arith.maximumf %12, %13 : vector<50x128xf32>
    %c0_12 = arith.constant 0 : index
    %c0_13 = arith.constant 0 : index
    %15 = vector.load %arg6[%c0_12, %c0_13] : memref<2x50xf32, #tpu.memory_space<vmem>>, vector<2x50xf32>
    %cst_14 = arith.constant dense<0.000000e+00> : vector<2x128xf32>
    %16 = tpu.matmul %15, %14, %cst_14 {dimension_numbers = #tpu.dot_dimension_numbers<[1], [0], [0], [1], [0, 0, 1, 1], [], []>} : vector<2x50xf32>, vector<50x128xf32>, vector<2x128xf32> -> vector<2x128xf32>
    %c0_15 = arith.constant 0 : index
    %c0_16 = arith.constant 0 : index
    %17 = vector.load %arg7[%c0_15, %c0_16] : memref<2x1xf32, #tpu.memory_space<vmem>>, vector<2x1xf32>
    %18 = vector.broadcast %17 : vector<2x1xf32> to vector<2x128xf32>
    %19 = arith.addf %16, %18 : vector<2x128xf32>
    %c0_17 = arith.constant 0 : index
    %c0_18 = arith.constant 0 : index
    %20 = vector.load %arg8[%c0_17, %c0_18] : memref<2x128xf32, #tpu.memory_space<vmem>>, vector<2x128xf32>
    tpu.vector_store %arg8[%c0_17, %c0_18], %19 {strides = array<i32>} : memref<2x128xf32, #tpu.memory_space<vmem>>, vector<2x128xf32>,
    return
  }
  func.func @transform_0(%arg0: i32) -> (i32, i32) {
    %c0_i32 = arith.constant 0 : i32
    %c0_i32_0 = arith.constant 0 : i32
    return %arg0, %c0_i32 : i32, i32
  }
  func.func @transform_1(%arg0: i32) -> (i32, i32) {
    %c0_i32 = arith.constant 0 : i32
    %c0_i32_0 = arith.constant 0 : i32
    %c0_i32_1 = arith.constant 0 : i32
    return %c0_i32, %c0_i32_0 : i32, i32
  }
  func.func @transform_2(%arg0: i32) -> (i32, i32) {
    %c0_i32 = arith.constant 0 : i32
    %c0_i32_0 = arith.constant 0 : i32
    %c0_i32_1 = arith.constant 0 : i32
    return %c0_i32, %c0_i32_0 : i32, i32
  }
  func.func @transform_3(%arg0: i32) -> (i32, i32) {
    %c0_i32 = arith.constant 0 : i32
    %c0_i32_0 = arith.constant 0 : i32
    %c0_i32_1 = arith.constant 0 : i32
    return %c0_i32, %c0_i32_0 : i32, i32
  }
  func.func @transform_4(%arg0: i32) -> (i32, i32) {
    %c0_i32 = arith.constant 0 : i32
    %c0_i32_0 = arith.constant 0 : i32
    %c0_i32_1 = arith.constant 0 : i32
    return %c0_i32, %c0_i32_0 : i32, i32
  }
  func.func @transform_5(%arg0: i32) -> (i32, i32) {
    %c0_i32 = arith.constant 0 : i32
    %c0_i32_0 = arith.constant 0 : i32
    %c0_i32_1 = arith.constant 0 : i32
    return %c0_i32, %c0_i32_0 : i32, i32
  }
  func.func @transform_6(%arg0: i32) -> (i32, i32) {
    %c0_i32 = arith.constant 0 : i32
    %c0_i32_0 = arith.constant 0 : i32
    %c0_i32_1 = arith.constant 0 : i32
    return %c0_i32, %c0_i32_0 : i32, i32
  }
  func.func @transform_7(%arg0: i32) -> (i32, i32) {
    %c0_i32 = arith.constant 0 : i32
    %c0_i32_0 = arith.constant 0 : i32
    return %c0_i32, %arg0 : i32, i32
  }
}

</mosaic_0001>

<bundles_post_ra>
// kernel: net_forward.1
= control target key start
LH: loop header
LB: loop body
LE: loop exit
PB: predicated region body
PF: predicated region fallthrough
CT: control target
= control target key end

     0   :  { %vm91_vm0 = vcmask 31744   ;;  %v433_v9 = vmov 0   ;;  %vm277_vm1 = vcmask 1041408   ;;  %vm255_vm2 = vcmask 408576   ;;  %s680_s0 = inlined_call_operand.vmem [shape: f32[128,4], index: 0, kind: input, shape index: {}]   ;;  %s681_s2 = inlined_call_operand.vmem [shape: f32[50,1], index: 2, kind: input, shape index: {}]   ;;  %s682_s4 = inlined_call_operand.vmem [shape: f32[50,1], index: 4, kind: input, shape index: {}]   ;;  %s683_s1 = inlined_call_operand.vmem [shape: f32[50,4], index: 1, kind: input, shape index: {}]   ;;  %s684_s6 = inlined_call_operand.vmem [shape: f32[2,1], index: 6, kind: input, shape index: {}]   ;;  %s685_s3 = inlined_call_operand.vmem [shape: f32[50,50], index: 3, kind: input, shape index: {}]   ;;  %s686_s5 = inlined_call_operand.vmem [shape: f32[2,50], index: 5, kind: input, shape index: {}]   ;;  %s687_s7 = inlined_call_operand.vmem [shape: f32[2,128], index: 7, kind: output, shape index: {}]  }
   0x1   :  { %v41_v0 = vld [vmem:[%s680_s0 + $0x78] sm:$0xff]  ;;  %v40_v1 = vld [vmem:[%s680_s0 + $0x70] sm:$0xff]  ;;  %v39_v2 = vld [vmem:[%s680_s0 + $0x68] sm:$0xff]  ;;  %430 = vset.pattern.permute.xlu0 %v433_v9  ;;  %431 = vset.pattern.permute.xlu1 %v433_v9 }
   0x2   :  { %397 = vmatpush.xpose.msk.msra.mxu2 %vm91_vm0, %v41_v0  ;;  %398 = vmatpush.xpose.msk.msra.mxu3 %vm91_vm0, %v41_v0  ;;  %v38_v3 = vld [vmem:[%s680_s0 + $0x60] sm:$0xff]  ;;  %v37_v4 = vld [vmem:[%s680_s0 + $0x58] sm:$0xff]  ;;  %v36_v5 = vld [vmem:[%s680_s0 + $0x50] sm:$0xff] }
   0x3   :  { %364 = vmatpush.xpose.msk.msra.mxu0 %vm91_vm0, %v41_v0  ;;  %v35_v6 = vld [vmem:[%s680_s0 + $0x48] sm:$0xff]  ;;  %v55_v7 = vld [vmem:[%s681_s2 + $0x30] sm:$0x3]  ;;  %v34_v8 = vld [vmem:[%s680_s0 + $0x40] sm:$0xff]  ;;  %432 = vset.pattern.permute.xlu2 %v433_v9 }
   0x4   :  { %88 = vperm.xlu0 %430, %v55_v7   ;;  %v53_v10 = vld [vmem:[%s681_s2 + $0x20] sm:$0xff]  ;;  %v33_v11 = vld [vmem:[%s680_s0 + $0x38] sm:$0xff]  ;;  %v54_v12 = vld [vmem:[%s681_s2 + $0x28] sm:$0xff] }
   0x5   :  { %78 = vperm.xlu1 %431, %v53_v10   ;;  %v32_v13 = vld [vmem:[%s680_s0 + $0x30] sm:$0xff]  ;;  %v52_v14 = vld [vmem:[%s681_s2 + $0x18] sm:$0xff]  ;;  %v31_v15 = vld [vmem:[%s680_s0 + $0x28] sm:$0xff] }
   0x6   :  { %399 = vmatpush.xpose.msk.msra.mxu2 %vm91_vm0, %v40_v1  ;;  %400 = vmatpush.xpose.msk.msra.mxu3 %vm91_vm0, %v40_v1  ;;  %v49_v16 = vld [vmem:[%s681_s2] sm:$0xff]  ;;  %v219_v18 = vld [vmem:[%s682_s4 + $0x30] sm:$0x3]  ;;  %v29_v19 = vld [vmem:[%s680_s0 + $0x18] sm:$0xff] }
   0x7   :  { %365 = vmatpush.xpose.msk.msra.mxu0 %vm91_vm0, %v40_v1  ;;  %v30_v17 = vld [vmem:[%s680_s0 + $0x20] sm:$0xff]  ;;  %v51_v21 = vld [vmem:[%s681_s2 + $0x10] sm:$0xff]  ;;  %v216_v23 = vld [vmem:[%s682_s4 + $0x18] sm:$0xff] }
   0x8   :  { %v217_v20 = vld [vmem:[%s682_s4 + $0x20] sm:$0xff]  ;;  %v28_v22 = vld [vmem:[%s680_s0 + $0x10] sm:$0xff]  ;;  %68 = vperm.xlu2 %432, %v51_v21   ;;  %v27_v24 = vld [vmem:[%s680_s0 + $0x8] sm:$0xff] }
   0x9   :  { %v50_v25 = vld [vmem:[%s681_s2 + $0x8] sm:$0xff]  ;;  %v26_v27 = vld [vmem:[%s680_s0] sm:$0xff]  ;;  %v44_v33 = vld [vmem:[%s683_s1 + $0x10] sm:$0xff] }
   0xa   :  { %401 = vmatpush.xpose.msk.msra.mxu2 %vm91_vm0, %v39_v2  ;;  %402 = vmatpush.xpose.msk.msra.mxu3 %vm91_vm0, %v39_v2  ;;  %v214_v26 = vld [vmem:[%s682_s4 + $0x8] sm:$0xff]  ;;  %v213_v28 = vld [vmem:[%s682_s4] sm:$0xff]  ;;  %v215_v35 = vld [vmem:[%s682_s4 + $0x10] sm:$0xff] }
   0xb   :  { %366 = vmatpush.xpose.msk.msra.mxu0 %vm91_vm0, %v39_v2  ;;  %v43_v29 = vld [vmem:[%s683_s1 + $0x8] sm:$0xff]  ;;  %v46_v30 = vld [vmem:[%s683_s1 + $0x20] sm:$0xff]  ;;  %v45_v36 = vld [vmem:[%s683_s1 + $0x18] sm:$0xff] }
   0xc   :  { %83 = vperm.xlu0 %430, %v54_v12   ;;  %v42_v31 = vld [vmem:[%s683_s1] sm:$0xff]  ;;  %v218_v32 = vld [vmem:[%s682_s4 + $0x28] sm:$0xff]  ;;  %v48_v37 = vld [vmem:[%s683_s1 + $0x30] sm:$0x3] }
   0xd   :  { %73 = vperm.xlu1 %431, %v52_v14   ;;  %v47_v34 = vld [vmem:[%s683_s1 + $0x28] sm:$0xff]  ;;  %v327_v38 = vld [vmem:[%s684_s6] sm:$0x3]  ;;  %v212_v9 = vld [vmem:[%s685_s3 + $0x30] sm:$0x3] }
   0xe   :  { %403 = vmatpush.xpose.msk.msra.mxu2 %vm91_vm0, %v38_v3  ;;  %404 = vmatpush.xpose.msk.msra.mxu3 %vm91_vm0, %v38_v3  ;;  %v210_v7 = vld [vmem:[%s685_s3 + $0x20] sm:$0xff] }
   0xf   :  { %367 = vmatpush.xpose.msk.msra.mxu0 %vm91_vm0, %v38_v3  ;;  %v206_v3 = vld [vmem:[%s685_s3] sm:$0xff] }
  0x10   :  { %63 = vperm.xlu2 %432, %v50_v25  }
  0x12   :  { %405 = vmatpush.xpose.msk.msra.mxu2 %vm91_vm0, %v37_v4  ;;  %406 = vmatpush.xpose.msk.msra.mxu3 %vm91_vm0, %v37_v4 }
  0x13   :  { %368 = vmatpush.xpose.msk.msra.mxu0 %vm91_vm0, %v37_v4  ;;  %v207_v4 = vld [vmem:[%s685_s3 + $0x8] sm:$0xff] }
  0x14   :  { %58 = vperm.xlu0 %430, %v49_v16  }
  0x15   :  { %252 = vperm.xlu1 %431, %v219_v18  }
  0x16   :  { %407 = vmatpush.xpose.msk.msra.mxu2 %vm91_vm0, %v36_v5  ;;  %408 = vmatpush.xpose.msk.msra.mxu3 %vm91_vm0, %v36_v5 }
  0x17   :  { %369 = vmatpush.xpose.msk.msra.mxu0 %vm91_vm0, %v36_v5  ;;  %v208_v5 = vld [vmem:[%s685_s3 + $0x10] sm:$0xff] }
  0x18   :  { %247 = vperm.xlu2 %432, %v218_v32  }
  0x1a   :  { %409 = vmatpush.xpose.msk.msra.mxu2 %vm91_vm0, %v35_v6  ;;  %410 = vmatpush.xpose.msk.msra.mxu3 %vm91_vm0, %v35_v6 }
  0x1b   :  { %370 = vmatpush.xpose.msk.msra.mxu0 %vm91_vm0, %v35_v6  ;;  %v209_v6 = vld [vmem:[%s685_s3 + $0x18] sm:$0xff] }
  0x1c   :  { %242 = vperm.xlu0 %430, %v217_v20  }
  0x1d   :  { %237 = vperm.xlu1 %431, %v216_v23  }
  0x1e   :  { %411 = vmatpush.xpose.msk.msra.mxu2 %vm91_vm0, %v34_v8  ;;  %412 = vmatpush.xpose.msk.msra.mxu3 %vm91_vm0, %v34_v8 }
  0x1f   :  { %371 = vmatpush.xpose.msk.msra.mxu0 %vm91_vm0, %v34_v8  ;;  %v211_v8 = vld [vmem:[%s685_s3 + $0x28] sm:$0xff] }
  0x20   :  { %232 = vperm.xlu2 %432, %v215_v35  }
  0x22   :  { %413 = vmatpush.xpose.msk.msra.mxu2 %vm91_vm0, %v33_v11  ;;  %414 = vmatpush.xpose.msk.msra.mxu3 %vm91_vm0, %v33_v11 }
  0x23   :  { %372 = vmatpush.xpose.msk.msra.mxu0 %vm91_vm0, %v33_v11 }
  0x24   :  { %227 = vperm.xlu0 %430, %v214_v26  }
  0x25   :  { %222 = vperm.xlu1 %431, %v213_v28  }
  0x26   :  { %415 = vmatpush.xpose.msk.msra.mxu2 %vm91_vm0, %v32_v13  ;;  %416 = vmatpush.xpose.msk.msra.mxu3 %vm91_vm0, %v32_v13 }
  0x27   :  { %373 = vmatpush.xpose.msk.msra.mxu0 %vm91_vm0, %v32_v13 }
  0x28   :  { %330 = vperm.xlu2 %432, %v327_v38   ;;  %v326_v38 = vld [vmem:[%s686_s5] sm:$0x3] }
  0x2a   :  { %417 = vmatpush.xpose.msk.msra.mxu2 %vm91_vm0, %v31_v15  ;;  %418 = vmatpush.xpose.msk.msra.mxu3 %vm91_vm0, %v31_v15 }
  0x2b   :  { %374 = vmatpush.xpose.msk.msra.mxu0 %vm91_vm0, %v31_v15 }
  0x2e   :  { %419 = vmatpush.xpose.msk.msra.mxu2 %vm91_vm0, %v30_v17  ;;  %420 = vmatpush.xpose.msk.msra.mxu3 %vm91_vm0, %v30_v17 }
  0x2f   :  { %375 = vmatpush.xpose.msk.msra.mxu0 %vm91_vm0, %v30_v17 }
  0x32   :  { %421 = vmatpush.xpose.msk.msra.mxu2 %vm91_vm0, %v29_v19  ;;  %422 = vmatpush.xpose.msk.msra.mxu3 %vm91_vm0, %v29_v19 }
  0x33   :  { %376 = vmatpush.xpose.msk.msra.mxu0 %vm91_vm0, %v29_v19 }
  0x36   :  { %423 = vmatpush.xpose.msk.msra.mxu2 %vm91_vm0, %v28_v22  ;;  %424 = vmatpush.xpose.msk.msra.mxu3 %vm91_vm0, %v28_v22 }
  0x37   :  { %377 = vmatpush.xpose.msk.msra.mxu0 %vm91_vm0, %v28_v22 }
  0x3a   :  { %425 = vmatpush.xpose.msk.msra.mxu2 %vm91_vm0, %v27_v24  ;;  %426 = vmatpush.xpose.msk.msra.mxu3 %vm91_vm0, %v27_v24 }
  0x3b   :  { %378 = vmatpush.xpose.msk.msra.mxu0 %vm91_vm0, %v27_v24 }
  0x3e   :  { %427 = vmatpush.xpose.msk.msra.mxu2 %vm91_vm0, %v26_v27  ;;  %428 = vmatpush.xpose.msk.msra.mxu3 %vm91_vm0, %v26_v27 }
  0x3f   :  { %379 = vmatpush.xpose.msk.msra.mxu0 %vm91_vm0, %v26_v27 }
  0x41   :  { %381 = vmatmul.msk.f32.vlgmr.msra.gmra.mxu2 %vm91_vm0, %v43_v29  ;;  %384 = vmatmul.msk.f32.vlgmr.msra.gmra.mxu3 %vm91_vm0, %v46_v30 }
  0x42   :  { %380 = vmatmul.msk.f32.vlgmr.msra.gmra.mxu0 %vm91_vm0, %v42_v31 }
  0x49   :  { %382 = vmatmul.msk.f32.gmra.mxu2 %vm91_vm0, %v44_v33  ;;  %385 = vmatmul.msk.f32.gmra.mxu3 %vm91_vm0, %v47_v34 }
  0x51   :  { %383 = vmatmul.msk.f32.gmra.mxu2 %vm91_vm0, %v45_v36  ;;  %386 = vmatmul.msk.f32.gmra.mxu3 %vm91_vm0, %v48_v37 }
  0x62   :  { %v69_v45 = vpop.permute.xlu2 %68 }
  0x6a   :  { %v64_v58 = vpop.permute.xlu2 %63 }
  0x72   :  { %v248_v17 = vpop.permute.xlu2 %247 }
  0x76   :  { %v89_v41 = vpop.permute.xlu0 %88 }
  0x77   :  { %v79_v44 = vpop.permute.xlu1 %78 }
  0x7a   :  { %v233_v27 = vpop.permute.xlu2 %232 }
  0x7e   :  { %v84_v46 = vpop.permute.xlu0 %83 }
  0x7f   :  { %v74_v53 = vpop.permute.xlu1 %73 }
  0x86   :  { %v59_v62 = vpop.permute.xlu0 %58 }
  0x87   :  { %v253_v15 = vpop.permute.xlu1 %252 }
  0x8e   :  { %v243_v18 = vpop.permute.xlu0 %242 }
  0x8f   :  { %v238_v19 = vpop.permute.xlu1 %237 }
  0x96   :  { %v228_v30 = vpop.permute.xlu0 %227 }
  0x97   :  { %v223_v33 = vpop.permute.xlu1 %222 }
  0xbf   :  { %v178_v59 = vpop.f32.mrf.mxu0 }
  0xc0   :  { %v179_v0 = vadd.f32 %v178_v59, %v59_v62 }
  0xc2   :  { %v199_v2 = vmax.f32 %v179_v0, 0.0 }
  0xc4   :  { %v181_v39 = vpop.f32.mrf.mxu2  ;;  %v190_v40 = vpop.f32.mrf.mxu3 }
  0xc5   :  { %v191_v51 = vadd.f32 %v190_v40, %v79_v44  ;;  %v182_v60 = vadd.f32 %v181_v39, %v64_v58  ;;  %v331_v39 = vpop.permute.xlu2 %330 }
  0xc7   :  { %v203_v56 = vmax.f32 %v191_v51, 0.0  ;;  %v200_v1 = vmax.f32 %v182_v60, 0.0 }
  0xcc   :  { %v184_v42 = vpop.f32.mrf.mxu2  ;;  %v193_v43 = vpop.f32.mrf.mxu3 }
  0xcd   :  { %v194_v48 = vadd.f32 %v193_v43, %v84_v46  ;;  %v185_v57 = vadd.f32 %v184_v42, %v69_v45 }
  0xcf   :  { %v204_v54 = vmax.f32 %v194_v48, 0.0  ;;  %v201_v63 = vmax.f32 %v185_v57, 0.0 }
  0xd4   :  { %v196_v47 = vpop.f32.mrf.mxu3  ;;  %v187_v50 = vpop.f32.mrf.mxu2 }
  0xd5   :  { %v197_v49 = vadd.f32 %v196_v47, %v89_v41  ;;  %v188_v55 = vadd.f32 %v187_v50, %v74_v53 }
  0xd7   :  { %v205_v52 = vmax.f32 %v197_v49, 0.0  ;;  %v202_v61 = vmax.f32 %v188_v55, 0.0 }
  0xd9   :  { %387 = vmatpush.msk.msra.mxu1 %vm277_vm1, %v205_v52 }
  0xdb   :  { %291 = vmatpush.msra.mxu1 %v204_v54 }
  0xdd   :  { %292 = vmatpush.msra.mxu1 %v203_v56 }
  0xdf   :  { %293 = vmatpush.msra.mxu1 %v202_v61 }
  0xe1   :  { %294 = vmatpush.msra.mxu1 %v201_v63 }
  0xe3   :  { %295 = vmatpush.msra.mxu1 %v200_v1 }
  0xe5   :  { %296 = vmatpush.msra.mxu1 %v199_v2 }
  0xe6   :  { %388 = vmatmul.msk.f32.vlgmr.msra.gmra.mxu1 %vm255_vm2, %v206_v3 }
  0xee   :  { %389 = vmatmul.msk.f32.gmra.mxu1 %vm255_vm2, %v207_v4 }
  0xf6   :  { %390 = vmatmul.msk.f32.gmra.mxu1 %vm255_vm2, %v208_v5 }
  0xfe   :  { %391 = vmatmul.msk.f32.gmra.mxu1 %vm255_vm2, %v209_v6 }
 0x106   :  { %392 = vmatmul.msk.f32.gmra.mxu1 %vm255_vm2, %v210_v7 }
 0x10e   :  { %393 = vmatmul.msk.f32.gmra.mxu1 %vm255_vm2, %v211_v8 }
 0x116   :  { %394 = vmatmul.msk.f32.gmra.mxu1 %vm255_vm2, %v212_v9 }
 0x163   :  { %v298_v10 = vpop.f32.mrf.mxu1 }
 0x164   :  { %v299_v34 = vadd.f32 %v298_v10, %v223_v33 }
 0x166   :  { %v319_v37 = vmax.f32 %v299_v34, 0.0 }
 0x16b   :  { %v301_v11 = vpop.f32.mrf.mxu1 }
 0x16c   :  { %v302_v31 = vadd.f32 %v301_v11, %v228_v30 }
 0x16e   :  { %v320_v36 = vmax.f32 %v302_v31, 0.0 }
 0x173   :  { %v304_v12 = vpop.f32.mrf.mxu1 }
 0x174   :  { %v305_v28 = vadd.f32 %v304_v12, %v233_v27 }
 0x176   :  { %v321_v35 = vmax.f32 %v305_v28, 0.0 }
 0x17b   :  { %v307_v13 = vpop.f32.mrf.mxu1 }
 0x17c   :  { %v308_v25 = vadd.f32 %v307_v13, %v238_v19 }
 0x17e   :  { %v322_v32 = vmax.f32 %v308_v25, 0.0 }
 0x183   :  { %v310_v14 = vpop.f32.mrf.mxu1 }
 0x184   :  { %v311_v23 = vadd.f32 %v310_v14, %v243_v18 }
 0x186   :  { %v323_v29 = vmax.f32 %v311_v23, 0.0 }
 0x18b   :  { %v313_v16 = vpop.f32.mrf.mxu1 }
 0x18c   :  { %v314_v21 = vadd.f32 %v313_v16, %v248_v17 }
 0x18e   :  { %v324_v26 = vmax.f32 %v314_v21, 0.0 }
 0x193   :  { %v316_v20 = vpop.f32.mrf.mxu1 }
 0x194   :  { %v317_v22 = vadd.f32 %v316_v20, %v253_v15 }
 0x196   :  { %v325_v24 = vmax.f32 %v317_v22, 0.0 }
 0x198   :  { %395 = vmatpush.msk.msrb.mxu1 %vm277_vm1, %v325_v24 }
 0x19a   :  { %349 = vmatpush.msrb.mxu1 %v324_v26 }
 0x19c   :  { %350 = vmatpush.msrb.mxu1 %v323_v29 }
 0x19e   :  { %351 = vmatpush.msrb.mxu1 %v322_v32 }
 0x1a0   :  { %352 = vmatpush.msrb.mxu1 %v321_v35 }
 0x1a2   :  { %353 = vmatpush.msrb.mxu1 %v320_v36 }
 0x1a4   :  { %354 = vmatpush.msrb.mxu1 %v319_v37 }
 0x1a5   :  { %396 = vmatmul.msk.f32.vlgmr.msrb.gmra.mxu1 %vm255_vm2, %v326_v38 }
 0x222   :  { %v356_v40 = vpop.f32.mrf.mxu1 }
 0x223   :  { %v357_v41 = vadd.f32 %v356_v40, %v331_v39 }
 0x225   :  { %359 = vst [vmem:[%s687_s7] sm:$0x3] %v357_v41 }

</bundles_post_ra>
